<compile_context>
chip_gen: v7x
topology: tpu7x:2x2x1
jax: 0.10.0
libtpu: 0.0.40
codegen_flags: <defaults>
</compile_context>

<pallas_src>
import functools

import jax
import jax.numpy as jnp
from jax.experimental import pallas as pl
from jax.experimental.pallas import tpu as pltpu

_LANE = 128
# Double-buffered-input VMEM budget for one batch tile (leaves headroom for
# compiler temporaries within the 32 MiB scoped VMEM on v7x/v6e, 16 MiB v5e).
_TILE_INPUT_BUDGET_BYTES = 16 * 1024 * 1024
_VMEM_LIMIT_BYTES = 32 * 1024 * 1024


def _skipgram_loss_kernel(in_ref, ctx_ref, out_ref, *, n_pos):
    # in_ref : (E, TB)     input embeddings, batch on lanes, E on sublanes
    # ctx_ref: (C, E, TB)  pos (first n_pos) then neg context embeddings
    # out_ref: (1, TB)     per-row loss, lane-dense
    in_e = in_ref[...].astype(jnp.float32)     # (E, TB)
    ctx = ctx_ref[...].astype(jnp.float32)     # (C, E, TB)

    # Per-(row, context) dot product over E (sublane axis) -> (C, TB).
    # Kept on VPU/XLU on purpose: operands are far too small for the MXU.
    scores = jnp.sum(ctx * in_e[None, :, :], axis=1)

    # First n_pos contexts keep their sign; negatives get flipped
    # (equivalent to torch.bmm(neg_embeddings, -input_embeddings)).
    c_idx = jax.lax.broadcasted_iota(jnp.int32, scores.shape, 0)
    signed = jnp.where(c_idx < n_pos, scores, -scores)

    # Numerically-stable log(sigmoid(x)), matches F.logsigmoid.
    log_sig = jnp.minimum(signed, 0.0) - jnp.log1p(jnp.exp(-jnp.abs(signed)))

    # loss = -(sum logsig(pos) + sum logsig(neg))   -> (1, TB), lane-dense
    out_ref[...] = -jnp.sum(log_sig, axis=0, keepdims=True)


def _choose_batch_tile(batch, n_ctx, embed, itemsize):
    """Largest 128-multiple batch tile whose double-buffered inputs fit budget."""
    bytes_per_row = (1 + n_ctx) * embed * itemsize          # in_emb + contexts
    tb = _TILE_INPUT_BUDGET_BYTES // (2 * bytes_per_row)    # x2: double buffer
    tb = max(_LANE, (tb // _LANE) * _LANE)
    padded_to_lane = pl.cdiv(batch, _LANE) * _LANE
    return min(tb, padded_to_lane)


def embedding_model_forward(embed_in, embed_out, input_labels, pos_labels,
                            neg_labels, *, transfer_dtype=jnp.float32):
    """JAX/Pallas equivalent of EmbeddingModel.forward. Returns (B,) float32.

    transfer_dtype: dtype used for the HBM->VMEM leg of the gathered
    embeddings (use jnp.bfloat16 to halve DMA bytes on mem-bound shapes;
    arithmetic is always done in float32 inside the kernel).
    """
    # Embedding lookups: plain-JAX gather glue; XLA fuses them with the
    # lane-dense transposes below.
    # TODO(synk): for E >= ~128, gather rows inside the kernel (scalar-prefetched
    # labels + manual DMA from an ANY-space table) to avoid the HBM round-trip.
    in_emb = jnp.take(embed_in, input_labels, axis=0)       # (B, E)
    pos_emb = jnp.take(embed_out, pos_labels, axis=0)       # (B, P, E)
    neg_emb = jnp.take(embed_out, neg_labels, axis=0)       # (B, N, E)

    B, E = in_emb.shape
    P = pos_emb.shape[1]
    N = neg_emb.shape[1]
    C = P + N

    # One context slab (pos then neg): a single dot/logsigmoid/reduce pass.
    ctx = jnp.concatenate([pos_emb, neg_emb], axis=1)       # (B, C, E)

    # Lane-dense layout: batch (big axis) on lanes, E on sublanes.
    in_t = in_emb.T.astype(transfer_dtype)                  # (E, B)
    ctx_t = jnp.transpose(ctx, (1, 2, 0)).astype(transfer_dtype)   # (C, E, B)

    itemsize = jnp.dtype(transfer_dtype).itemsize
    TB = _choose_batch_tile(B, C, E, itemsize)
    padded_B = pl.cdiv(B, TB) * TB
    if padded_B != B:
        # Zero padding is harmless: dot=0 -> logsigmoid(0) finite, sliced off below.
        in_t = jnp.pad(in_t, ((0, 0), (0, padded_B - B)))
        ctx_t = jnp.pad(ctx_t, ((0, 0), (0, 0), (0, padded_B - B)))

    kernel = functools.partial(_skipgram_loss_kernel, n_pos=P)
    out = pl.pallas_call(
        kernel,
        out_shape=jax.ShapeDtypeStruct((1, padded_B), jnp.float32),
        grid=(padded_B // TB,),
        in_specs=[
            pl.BlockSpec((E, TB), lambda i: (0, i)),
            pl.BlockSpec((C, E, TB), lambda i: (0, 0, i)),
        ],
        out_specs=pl.BlockSpec((1, TB), lambda i: (0, i)),
        compiler_params=pltpu.CompilerParams(
            dimension_semantics=("parallel",),
            vmem_limit_bytes=_VMEM_LIMIT_BYTES,
        ),
    )(in_t, ctx_t)
    return out[0, :B]


def _reference_forward(embed_in, embed_out, input_labels, pos_labels, neg_labels):
    in_emb = jnp.take(embed_in, input_labels, axis=0)
    pos_emb = jnp.take(embed_out, pos_labels, axis=0)
    neg_emb = jnp.take(embed_out, neg_labels, axis=0)
    pos_dot = jnp.einsum("bpe,be->bp", pos_emb, in_emb)
    neg_dot = jnp.einsum("bne,be->bn", neg_emb, -in_emb)
    log_pos = jax.nn.log_sigmoid(pos_dot).sum(axis=1)
    log_neg = jax.nn.log_sigmoid(neg_dot).sum(axis=1)
    return -(log_pos + log_neg)


if __name__ == "__main__":
    # Small, deterministic problem sizes consistent with the module's forward.
    vocab_size = 50
    embed_size = 32      # E
    batch = 8            # B
    n_pos = 6            # P (context window)
    n_neg = 10           # N (negative samples)

    key = jax.random.PRNGKey(0)
    k_in, k_out, k_il, k_pos, k_neg = jax.random.split(key, 5)

    # nn.Embedding default init ~ N(0, 1), deterministic here via PRNGKey(0).
    embed_in = jax.random.normal(k_in, (vocab_size, embed_size), dtype=jnp.float32)
    embed_out = jax.random.normal(k_out, (vocab_size, embed_size), dtype=jnp.float32)

    input_labels = jax.random.randint(k_il, (batch,), 0, vocab_size, dtype=jnp.int32)
    pos_labels = jax.random.randint(k_pos, (batch, n_pos), 0, vocab_size, dtype=jnp.int32)
    neg_labels = jax.random.randint(k_neg, (batch, n_neg), 0, vocab_size, dtype=jnp.int32)

    loss = embedding_model_forward(embed_in, embed_out, input_labels, pos_labels, neg_labels)
    loss = jax.block_until_ready(loss)

    ref = _reference_forward(embed_in, embed_out, input_labels, pos_labels, neg_labels)
    assert loss.shape == (batch,)
    assert jnp.allclose(loss, ref, atol=1e-4, rtol=1e-4)

    print("KERNEL_OK")
</pallas_src>

<mosaic_0001>
module attributes {stable_mosaic.version = 11 : i64} {
  func.func @_skipgram_loss_kernel(%arg0: i32, %arg1: memref<32x128xf32, #tpu.memory_space<vmem>>, %arg2: memref<16x32x128xf32, #tpu.memory_space<vmem>>, %arg3: memref<1x128xf32, #tpu.memory_space<vmem>>) attributes {dimension_semantics = [#tpu.dimension_semantics<parallel>], iteration_bounds = array<i64: 1>, scalar_prefetch = 0 : i64, scratch_operands = 0 : i64, tpu.core_type = #tpu.core_type<tc>, window_params = [{transform_indices = @transform_0, window_bounds = array<i64: 32, 128>}, {transform_indices = @transform_1, window_bounds = array<i64: 16, 32, 128>}, {transform_indices = @transform_2, window_bounds = array<i64: 1, 128>}]} {
    %c0 = arith.constant 0 : index
    %c0_0 = arith.constant 0 : index
    %0 = vector.load %arg1[%c0, %c0_0] : memref<32x128xf32, #tpu.memory_space<vmem>>, vector<32x128xf32>
    %c0_1 = arith.constant 0 : index
    %c0_2 = arith.constant 0 : index
    %c0_3 = arith.constant 0 : index
    %1 = vector.load %arg2[%c0_1, %c0_2, %c0_3] : memref<16x32x128xf32, #tpu.memory_space<vmem>>, vector<16x32x128xf32>
    %2 = vector.shape_cast %0 : vector<32x128xf32> to vector<1x32x128xf32>
    %3 = vector.broadcast %2 : vector<1x32x128xf32> to vector<16x32x128xf32>
    %4 = arith.mulf %1, %3 : vector<16x32x128xf32>
    %cst = arith.constant dense<0.000000e+00> : vector<16x128xf32>
    %5 = vector.multi_reduction <add>, %4, %cst [1] : vector<16x32x128xf32> to vector<16x128xf32>
    %6 = tpu.iota {dimensions = array<i32: 0>} : vector<16x128xi32>
    %c6_i32 = arith.constant 6 : i32
    %7 = vector.broadcast %c6_i32 : i32 to vector<16x128xi32>
    %8 = arith.cmpi slt, %6, %7 : vector<16x128xi32>
    %cst_4 = arith.constant 0.000000e+00 : f32
    %9 = vector.broadcast %cst_4 : f32 to vector<16x128xf32>
    %10 = arith.subf %9, %5 : vector<16x128xf32>
    %11 = arith.select %8, %5, %10 : vector<16x128xi1>, vector<16x128xf32>
    %cst_5 = arith.constant 0.000000e+00 : f32
    %12 = vector.broadcast %cst_5 : f32 to vector<16x128xf32>
    %13 = arith.minimumf %11, %12 : vector<16x128xf32>
    %14 = math.absf %11 : vector<16x128xf32>
    %cst_6 = arith.constant 0.000000e+00 : f32
    %15 = vector.broadcast %cst_6 : f32 to vector<16x128xf32>
    %16 = arith.subf %15, %14 : vector<16x128xf32>
    %17 = math.exp %16 : vector<16x128xf32>
    %18 = math.log1p %17 : vector<16x128xf32>
    %19 = arith.subf %13, %18 : vector<16x128xf32>
    %cst_7 = arith.constant dense<0.000000e+00> : vector<128xf32>
    %20 = vector.multi_reduction <add>, %19, %cst_7 [0] : vector<16x128xf32> to vector<128xf32>
    %21 = vector.shape_cast %20 : vector<128xf32> to vector<1x128xf32>
    %cst_8 = arith.constant 0.000000e+00 : f32
    %22 = vector.broadcast %cst_8 : f32 to vector<1x128xf32>
    %23 = arith.subf %22, %21 : vector<1x128xf32>
    %c0_9 = arith.constant 0 : index
    %c0_10 = arith.constant 0 : index
    %24 = vector.load %arg3[%c0_9, %c0_10] : memref<1x128xf32, #tpu.memory_space<vmem>>, vector<1x128xf32>
    tpu.vector_store %arg3[%c0_9, %c0_10], %23 {strides = array<i32>} : memref<1x128xf32, #tpu.memory_space<vmem>>, vector<1x128xf32>,
    return
  }
  func.func @transform_0(%arg0: i32) -> (i32, i32) {
    %c0_i32 = arith.constant 0 : i32
    %c0_i32_0 = arith.constant 0 : i32
    return %c0_i32, %arg0 : i32, i32
  }
  func.func @transform_1(%arg0: i32) -> (i32, i32, i32) {
    %c0_i32 = arith.constant 0 : i32
    %c0_i32_0 = arith.constant 0 : i32
    %c0_i32_1 = arith.constant 0 : i32
    return %c0_i32, %c0_i32_0, %arg0 : i32, i32, i32
  }
  func.func @transform_2(%arg0: i32) -> (i32, i32) {
    %c0_i32 = arith.constant 0 : i32
    %c0_i32_0 = arith.constant 0 : i32
    return %c0_i32, %arg0 : i32, i32
  }
}

</mosaic_0001>

<bundles_post_ra>
// kernel: tpu_custom_call.1
= control target key start
LH: loop header
LB: loop body
LE: loop exit
PB: predicated region body
PF: predicated region fallthrough
CT: control target
= control target key end

     0   :  { %7 = vsyncpa [#allocation3], 0  ;;  %s908_s0 = inlined_call_operand.hbm [shape: f32[32,128], index: 0, kind: input, shape index: {}]   ;;  %s909_s1 = inlined_call_operand.hbm [shape: f32[16,32,128], index: 1, kind: input, shape index: {}]   ;;  %s910_s2 = inlined_call_operand.hbm [shape: f32[1,128], index: 2, kind: output, shape index: {}]  }
   0x1   :  { %8 = vsyncpa [#allocation6], 0 }
   0x2   :  { %9 = vsyncpa [#allocation4], 0  ;;  %s550_s9 = smov [#allocation2]   ;;  %s478_s13 = scalar_lea.hbm %s908_s0, 512 }
   0x3   :  { %s15_s10 = sshll.u32 %s550_s9, 4  ;;  %p479_p0 = scmp.ne.s32.totalorder %s908_s0, %s478_s13  ;;  %s16_s10 = int_to_ptr.vmem [resolvable:$true] %s15_s10 }
   0x4   :  { %p482_p1 = scmp.lt.u32.totalorder %s478_s13, %s908_s0 }
   0x6   :  { %p484_p2 = pnand %p482_p1, %p479_p0 }
   0x8   :  { %487 = shalt.err (!%p484_p2)
}
   0x9   :  { %s488_s18 = scalar_lea.vmem %s16_s10, 512  ;;  %p493_p4 = scmp.lt.s32.totalorder %s16_s10, %s16_s10 }
   0xa   :  { %p489_p3 = scmp.ne.s32.totalorder %s16_s10, %s488_s18  ;;  %p494_p5 = scmp.lt.s32.totalorder %s488_s18, %s488_s18 }
   0xc   :  { %p495_p6 = por %p494_p5, %p493_p4 }
   0xe   :  { %p496_p7 = pnand %p495_p6, %p489_p3 }
  0x10   :  { %499 = shalt.err (!%p496_p7)
}
  0x11   :  { %s551_s19 = smov 128   ;;  %s552_s20 = smov 8  }
  0x12   :  { %21 = dma.hbm_to_vmem [thread:$0]  %s908_s0, 512, %s16_s10, [#allocation3], %s551_s19, %s551_s19, %s552_s20  }
  0x13   :  { %s553_s23 = smov [#allocation5]   ;;  %s500_s27 = scalar_lea.hbm %s909_s1, 8192 }
  0x14   :  { %s27_s24 = sshll.u32 %s553_s23, 4  ;;  %p501_p8 = scmp.ne.s32.totalorder %s909_s1, %s500_s27  ;;  %s28_s24 = int_to_ptr.vmem [resolvable:$true] %s27_s24 }
  0x15   :  { %p504_p9 = scmp.lt.u32.totalorder %s500_s27, %s909_s1 }
  0x17   :  { %p506_p10 = pnand %p504_p9, %p501_p8 }
  0x19   :  { %509 = shalt.err (!%p506_p10)
}
  0x1a   :  { %s510_s4 = scalar_lea.vmem %s28_s24, 8192  ;;  %p515_p12 = scmp.lt.s32.totalorder %s28_s24, %s28_s24 }
  0x1b   :  { %p511_p11 = scmp.ne.s32.totalorder %s28_s24, %s510_s4  ;;  %p516_p13 = scmp.lt.s32.totalorder %s510_s4, %s510_s4 }
  0x1d   :  { %p517_p0 = por %p516_p13, %p515_p12 }
  0x1f   :  { %p518_p1 = pnand %p517_p0, %p511_p11 }
  0x21   :  { %521 = shalt.err (!%p518_p1)
}
  0x22   :  { %33 = dma.hbm_to_vmem [thread:$0]  %s909_s1, 8192, %s28_s24, [#allocation6], %s551_s19, %s551_s19, %s552_s20  }
  0x23   :  { %544 = dma.done.wait [#allocation3], 512  }
  0x24   :  { %545 = vsyncadd [#allocation3], 4294966784 }
  0x25   :  { %546 = dma.done.wait [#allocation6], 8192  }
  0x26   :  { %547 = vsyncadd [#allocation6], 4294959104  ;;  %v316_v0 = vlaneseq  ;;  %v594_v1 = vld [vmem:[#allocation2] sm:$0xff]  ;;  %v596_v2 = vld [vmem:[#allocation2 + $0x8] sm:$0xff]  ;;  %vm353_vm0 = vcmask 1041409   ;;  %vm355_vm1 = vcmask 1042434  }
  0x27   :  { %v598_v3 = vld [vmem:[#allocation2 + $0x10] sm:$0xff]  ;;  %v600_v4 = vld [vmem:[#allocation2 + $0x18] sm:$0xff]  ;;  %v44_v5 = vld [vmem:[#allocation5] sm:$0xff]  ;;  %vm357_vm2 = vcmask 1043459   ;;  %vm359_vm3 = vcmask 1044484   ;;  %vm361_vm4 = vcmask 1045509  }
  0x28   :  { %v45_v6 = vld [vmem:[#allocation5 + $0x8] sm:$0xff]  ;;  %v46_v7 = vld [vmem:[#allocation5 + $0x10] sm:$0xff]  ;;  %v47_v8 = vld [vmem:[#allocation5 + $0x18] sm:$0xff]  ;;  %v108_v10 = vmul.f32 %v44_v5, %v594_v1  ;;  %v606_v17 = vshrl.u32 %v316_v0, 7  ;;  %vm363_vm5 = vcmask 1046534   ;;  %vm365_vm6 = vcmask 1047559  }
  0x29   :  { %v48_v9 = vld [vmem:[#allocation5 + $0x20] sm:$0xff]  ;;  %v109_v11 = vmul.f32 %v45_v6, %v596_v2  ;;  %v49_v12 = vld [vmem:[#allocation5 + $0x28] sm:$0xff]  ;;  %v50_v13 = vld [vmem:[#allocation5 + $0x30] sm:$0xff]  ;;  %v110_v15 = vmul.f32 %v46_v7, %v598_v3  ;;  %v111_v21 = vmul.f32 %v47_v8, %v600_v4  ;;  %s554_s1 = smov [#allocation7]  }
  0x2a   :  { %v51_v14 = vld [vmem:[#allocation5 + $0x38] sm:$0xff]  ;;  %v112_v16 = vmul.f32 %v48_v9, %v594_v1  ;;  %911 = vst [vmem:[#allocation11_spill] sm:$0xff] %v606_v17  ;;  %v52_v18 = vld [vmem:[#allocation5 + $0x40] sm:$0xff]  ;;  %v53_v19 = vld [vmem:[#allocation5 + $0x48] sm:$0xff]  ;;  %v113_v22 = vmul.f32 %v49_v12, %v596_v2  ;;  %v114_v23 = vmul.f32 %v50_v13, %v598_v3  ;;  %s455_s6 = sshll.u32 %s554_s1, 4  ;;  %s456_s6 = int_to_ptr.vmem [resolvable:$true] %s455_s6 }
  0x2b   :  { %v54_v20 = vld [vmem:[#allocation5 + $0x50] sm:$0xff]  ;;  %v172_v24 = vadd.f32 %v109_v11, %v108_v10  ;;  %v55_v25 = vld [vmem:[#allocation5 + $0x58] sm:$0xff]  ;;  %v56_v26 = vld [vmem:[#allocation5 + $0x60] sm:$0xff]  ;;  %v115_v28 = vmul.f32 %v51_v14, %v600_v4  ;;  %v613_v29 = vmul.f32 %v52_v18, %v594_v1  ;;  %v616_v30 = vmul.f32 %v53_v19, %v596_v2  ;;  %s522_s7 = scalar_lea.vmem %s456_s6, 16  ;;  %s526_s8 = scalar_lea.vmem %s456_s6, 32 }
  0x2c   :  { %v57_v27 = vld [vmem:[#allocation5 + $0x68] sm:$0xff]  ;;  %v619_v31 = vmul.f32 %v54_v20, %v598_v3  ;;  %v58_v32 = vld [vmem:[#allocation5 + $0x70] sm:$0xff]  ;;  %v59_v33 = vld [vmem:[#allocation5 + $0x78] sm:$0xff]  ;;  %v622_v35 = vmul.f32 %v55_v25, %v600_v4  ;;  %v625_v36 = vmul.f32 %v56_v26, %v594_v1  ;;  %v181_v45 = vadd.f32 %v113_v22, %v112_v16  ;;  %p523_p2 = scmp.ne.s32.totalorder %s456_s6, %s522_s7  ;;  %p527_p3 = scmp.lt.s32.totalorder %s456_s6, %s456_s6 }
  0x2d   :  { %v60_v34 = vld [vmem:[#allocation5 + $0x80] sm:$0xff]  ;;  %v628_v37 = vmul.f32 %v57_v27, %v596_v2  ;;  %v173_v38 = vadd.f32 %v172_v24, %v110_v15  ;;  %v61_v39 = vld [vmem:[#allocation5 + $0x88] sm:$0xff]  ;;  %v62_v40 = vld [vmem:[#allocation5 + $0x90] sm:$0xff]  ;;  %v631_v42 = vmul.f32 %v58_v32, %v598_v3  ;;  %v634_v43 = vmul.f32 %v59_v33, %v600_v4  ;;  %p528_p4 = scmp.lt.s32.totalorder %s526_s8, %s522_s7 }
  0x2e   :  { %v63_v41 = vld [vmem:[#allocation5 + $0x98] sm:$0xff]  ;;  %v637_v44 = vmul.f32 %v60_v34, %v594_v1  ;;  %v64_v46 = vld [vmem:[#allocation5 + $0xa0] sm:$0xff]  ;;  %v65_v47 = vld [vmem:[#allocation5 + $0xa8] sm:$0xff]  ;;  %v640_v49 = vmul.f32 %v61_v39, %v596_v2  ;;  %v643_v50 = vmul.f32 %v62_v40, %v598_v3  ;;  %v182_v59 = vadd.f32 %v181_v45, %v114_v23 }
  0x2f   :  { %v66_v48 = vld [vmem:[#allocation5 + $0xb0] sm:$0xff]  ;;  %v646_v51 = vmul.f32 %v63_v41, %v600_v4  ;;  %v174_v52 = vadd.f32 %v173_v38, %v111_v21  ;;  %v67_v53 = vld [vmem:[#allocation5 + $0xb8] sm:$0xff]  ;;  %v68_v54 = vld [vmem:[#allocation5 + $0xc0] sm:$0xff]  ;;  %v649_v56 = vmul.f32 %v64_v46, %v594_v1  ;;  %v652_v57 = vmul.f32 %v65_v47, %v596_v2  ;;  %p529_p5 = por %p528_p4, %p527_p3 }
  0x30   :  { %v69_v55 = vld [vmem:[#allocation5 + $0xc8] sm:$0xff]  ;;  %v655_v58 = vmul.f32 %v66_v48, %v598_v3  ;;  %v70_v60 = vld [vmem:[#allocation5 + $0xd0] sm:$0xff]  ;;  %v71_v61 = vld [vmem:[#allocation5 + $0xd8] sm:$0xff]  ;;  %v658_v63 = vmul.f32 %v67_v53, %v600_v4  ;;  %v661_v0 = vmul.f32 %v68_v54, %v594_v1  ;;  %v183_v13 = vadd.f32 %v182_v59, %v115_v28 }
  0x31   :  { %v72_v62 = vld [vmem:[#allocation5 + $0xe0] sm:$0xff]  ;;  %v664_v5 = vmul.f32 %v69_v55, %v596_v2  ;;  %v175_v6 = vrot.slane %v174_v52, 4  ;;  %v73_v7 = vld [vmem:[#allocation5 + $0xe8] sm:$0xff]  ;;  %v74_v8 = vld [vmem:[#allocation5 + $0xf0] sm:$0xff]  ;;  %v667_v10 = vmul.f32 %v70_v60, %v598_v3  ;;  %v670_v11 = vmul.f32 %v71_v61, %v600_v4  ;;  %p530_p6 = pnand %p529_p5, %p523_p2 }
  0x32   :  { %v75_v9 = vld [vmem:[#allocation5 + $0xf8] sm:$0xff]  ;;  %v673_v12 = vmul.f32 %v72_v62, %v594_v1  ;;  %v76_v14 = vld [vmem:[#allocation5 + $0x100] sm:$0xff]  ;;  %v77_v15 = vld [vmem:[#allocation5 + $0x108] sm:$0xff]  ;;  %v676_v18 = vmul.f32 %v73_v7, %v596_v2  ;;  %v679_v19 = vmul.f32 %v74_v8, %v598_v3  ;;  %v184_v28 = vrot.slane %v183_v13, 4 }
  0x33   :  { %v78_v16 = vld [vmem:[#allocation5 + $0x110] sm:$0xff]  ;;  %v682_v20 = vmul.f32 %v75_v9, %v600_v4  ;;  %v176_v21 = vadd.f32 %v175_v6, %v174_v52  ;;  %v79_v22 = vld [vmem:[#allocation5 + $0x118] sm:$0xff]  ;;  %v80_v23 = vld [vmem:[#allocation5 + $0x120] sm:$0xff]  ;;  %v685_v25 = vmul.f32 %v76_v14, %v594_v1  ;;  %v688_v26 = vmul.f32 %v77_v15, %v596_v2 }
  0x34   :  { %v81_v24 = vld [vmem:[#allocation5 + $0x128] sm:$0xff]  ;;  %v691_v27 = vmul.f32 %v78_v16, %v598_v3  ;;  %v82_v32 = vld [vmem:[#allocation5 + $0x130] sm:$0xff]  ;;  %v83_v33 = vld [vmem:[#allocation5 + $0x138] sm:$0xff]  ;;  %v694_v38 = vmul.f32 %v79_v22, %v600_v4  ;;  %v697_v39 = vmul.f32 %v80_v23, %v594_v1  ;;  %v185_v54 = vadd.f32 %v184_v28, %v183_v13 }
  0x35   :  { %v84_v34 = vld [vmem:[#allocation5 + $0x140] sm:$0xff]  ;;  %v700_v40 = vmul.f32 %v81_v24, %v596_v2  ;;  %v177_v41 = vrot.slane %v176_v21, 2  ;;  %v85_v45 = vld [vmem:[#allocation5 + $0x148] sm:$0xff]  ;;  %v86_v46 = vld [vmem:[#allocation5 + $0x150] sm:$0xff]  ;;  %v703_v48 = vmul.f32 %v82_v32, %v598_v3  ;;  %v706_v52 = vmul.f32 %v83_v33, %v600_v4 }
  0x36   :  { %v87_v47 = vld [vmem:[#allocation5 + $0x158] sm:$0xff]  ;;  %v709_v53 = vmul.f32 %v84_v34, %v594_v1  ;;  %v88_v55 = vld [vmem:[#allocation5 + $0x160] sm:$0xff]  ;;  %v89_v59 = vld [vmem:[#allocation5 + $0x168] sm:$0xff]  ;;  %v712_v61 = vmul.f32 %v85_v45, %v596_v2  ;;  %v715_v62 = vmul.f32 %v86_v46, %v598_v3  ;;  %v186_v22 = vrot.slane %v185_v54, 2 }
  0x37   :  { %v90_v60 = vld [vmem:[#allocation5 + $0x170] sm:$0xff]  ;;  %v718_v6 = vmul.f32 %v87_v47, %v600_v4  ;;  %v178_v7 = vadd.f32 %v177_v41, %v176_v21  ;;  %v91_v8 = vld [vmem:[#allocation5 + $0x178] sm:$0xff]  ;;  %v92_v9 = vld [vmem:[#allocation5 + $0x180] sm:$0xff]  ;;  %v721_v15 = vmul.f32 %v88_v55, %v594_v1  ;;  %v724_v13 = vmul.f32 %v89_v59, %v596_v2 }
  0x38   :  { %v93_v14 = vld [vmem:[#allocation5 + $0x188] sm:$0xff]  ;;  %v727_v16 = vmul.f32 %v90_v60, %v598_v3  ;;  %v94_v23 = vld [vmem:[#allocation5 + $0x190] sm:$0xff]  ;;  %v95_v24 = vld [vmem:[#allocation5 + $0x198] sm:$0xff]  ;;  %v730_v32 = vmul.f32 %v91_v8, %v600_v4  ;;  %v733_v21 = vmul.f32 %v92_v9, %v594_v1  ;;  %v187_v60 = vadd.f32 %v186_v22, %v185_v54 }
  0x39   :  { %912 = vst [vmem:[#allocation12_spill] sm:$0xff] %v718_v6  ;;  %v96_v28 = vld [vmem:[#allocation5 + $0x1a0] sm:$0xff]  ;;  %v736_v33 = vmul.f32 %v93_v14, %v596_v2  ;;  %v179_v34 = vrot.slane %v178_v7, 1  ;;  %v97_v41 = vld [vmem:[#allocation5 + $0x1a8] sm:$0xff]  ;;  %v98_v45 = vld [vmem:[#allocation5 + $0x1b0] sm:$0xff]  ;;  %v739_v47 = vmul.f32 %v94_v23, %v598_v3  ;;  %v742_v55 = vmul.f32 %v95_v24, %v600_v4 }
  0x3a   :  { %913 = vst [vmem:[#allocation13_spill] sm:$0xff] %v730_v32  ;;  %v99_v46 = vld [vmem:[#allocation5 + $0x1b8] sm:$0xff]  ;;  %v745_v59 = vmul.f32 %v96_v28, %v594_v1  ;;  %v100_v8 = vld [vmem:[#allocation5 + $0x1c0] sm:$0xff]  ;;  %v101_v9 = vld [vmem:[#allocation5 + $0x1c8] sm:$0xff]  ;;  %v748_v14 = vmul.f32 %v97_v41, %v596_v2  ;;  %v751_v32 = vmul.f32 %v98_v45, %v598_v3  ;;  %v188_v41 = vrot.slane %v187_v60, 1 }
  0x3b   :  { %914 = vst [vmem:[#allocation14_spill] sm:$0xff] %v739_v47  ;;  %915 = vst [vmem:[#allocation15_spill] sm:$0xff] %v742_v55  ;;  %v102_v17 = vld [vmem:[#allocation5 + $0x1d0] sm:$0xff]  ;;  %v754_v6 = vmul.f32 %v99_v46, %v600_v4  ;;  %v756_v23 = vadd.f32 %v179_v34, %v178_v7  ;;  %v103_v24 = vld [vmem:[#allocation5 + $0x1d8] sm:$0xff]  ;;  %v759_v28 = vmul.f32 %v100_v8, %v594_v1 }
  0x3c   :  { %916 = vst [vmem:[#allocation16_spill] sm:$0xff] %v751_v32  ;;  %v104_v55 = vld [vmem:[#allocation5 + $0x1e0] sm:$0xff]  ;;  %v105_v47 = vld [vmem:[#allocation5 + $0x1e8] sm:$0xff]  ;;  %v762_v54 = vmul.f32 %v101_v9, %v596_v2  ;;  %v765_v22 = vmul.f32 %v102_v17, %v598_v3  ;;  %v106_v45 = vld [vmem:[#allocation5 + $0x1f0] sm:$0xff]  ;;  %v768_v46 = vmul.f32 %v103_v24, %v600_v4  ;;  %v190_v8 = vadd.f32 %v616_v30, %v613_v29 }
  0x3d   :  { %917 = vst [vmem:[#allocation17_spill] sm:$0xff] %v754_v6  ;;  %v107_v32 = vld [vmem:[#allocation5 + $0x1f8] sm:$0xff]  ;;  %v771_v7 = vmul.f32 %v104_v55, %v594_v1  ;;  %v774_v34 = vmul.f32 %v105_v47, %v596_v2  ;;  %v779_v9 = vmul.f32 %v106_v45, %v598_v3  ;;  %v784_v6 = vadd.f32 %v188_v41, %v187_v60 }
  0x3e   :  { %v782_v17 = vmul.f32 %v107_v32, %v600_v4  ;;  %v199_v24 = vadd.f32 %v628_v37, %v625_v36  ;;  %v191_v1 = vadd.f32 %v190_v8, %v619_v31  ;;  %v208_v2 = vadd.f32 %v640_v49, %v637_v44 }
  0x3f   :  { %v217_v47 = vadd.f32 %v652_v57, %v649_v56  ;;  %v226_v3 = vadd.f32 %v664_v5, %v661_v0  ;;  %v235_v4 = vadd.f32 %v676_v18, %v673_v12  ;;  %v244_v30 = vadd.f32 %v688_v26, %v685_v25 }
  0x40   :  { %v200_v29 = vadd.f32 %v199_v24, %v631_v42  ;;  %v253_v31 = vadd.f32 %v700_v40, %v697_v39  ;;  %v192_v36 = vadd.f32 %v191_v1, %v622_v35  ;;  %v209_v37 = vadd.f32 %v208_v2, %v643_v50 }
  0x41   :  { %v218_v44 = vadd.f32 %v217_v47, %v655_v58  ;;  %v227_v49 = vadd.f32 %v226_v3, %v667_v10  ;;  %v236_v42 = vadd.f32 %v235_v4, %v679_v19  ;;  %v245_v57 = vadd.f32 %v244_v30, %v691_v27 }
  0x42   :  { %v201_v56 = vadd.f32 %v200_v29, %v634_v43  ;;  %v254_v0 = vadd.f32 %v253_v31, %v703_v48  ;;  %v193_v5 = vrot.slane %v192_v36, 4  ;;  %v210_v12 = vadd.f32 %v209_v37, %v646_v51 }
  0x43   :  { %v219_v18 = vadd.f32 %v218_v44, %v658_v63  ;;  %v228_v35 = vadd.f32 %v227_v49, %v670_v11  ;;  %v237_v58 = vadd.f32 %v236_v42, %v682_v20  ;;  %v246_v10 = vadd.f32 %v245_v57, %v694_v38 }
  0x44   :  { %v202_v50 = vrot.slane %v201_v56, 4  ;;  %v255_v43 = vadd.f32 %v254_v0, %v706_v52  ;;  %v194_v25 = vadd.f32 %v193_v5, %v192_v36  ;;  %v211_v19 = vrot.slane %v210_v12, 4 }
  0x45   :  { %v220_v26 = vrot.slane %v219_v18, 4  ;;  %v229_v27 = vrot.slane %v228_v35, 4  ;;  %v238_v40 = vrot.slane %v237_v58, 4  ;;  %v247_v48 = vrot.slane %v246_v10, 4 }
  0x46   :  { %v203_v39 = vadd.f32 %v202_v50, %v201_v56  ;;  %v256_v32 = vrot.slane %v255_v43, 4  ;;  %v195_v51 = vrot.slane %v194_v25, 2  ;;  %v212_v55 = vadd.f32 %v211_v19, %v210_v12 }
  0x47   :  { %v221_v63 = vadd.f32 %v220_v26, %v219_v18  ;;  %v230_v60 = vadd.f32 %v229_v27, %v228_v35  ;;  %v239_v41 = vadd.f32 %v238_v40, %v237_v58  ;;  %v248_v45 = vadd.f32 %v247_v48, %v246_v10 }
  0x48   :  { %v204_v11 = vrot.slane %v203_v39, 2  ;;  %v257_v20 = vadd.f32 %v256_v32, %v255_v43  ;;  %v196_v8 = vadd.f32 %v195_v51, %v194_v25  ;;  %v213_v38 = vrot.slane %v212_v55, 2 }
  0x49   :  { %v222_v24 = vrot.slane %v221_v63, 2  ;;  %v231_v52 = vrot.slane %v230_v60, 2  ;;  %v240_v2 = vrot.slane %v239_v41, 2  ;;  %v249_v47 = vrot.slane %v248_v45, 2 }
  0x4a   :  { %v205_v1 = vadd.f32 %v204_v11, %v203_v39  ;;  %v258_v3 = vrot.slane %v257_v20, 2  ;;  %v197_v29 = vrot.slane %v196_v8, 1  ;;  %v214_v4 = vadd.f32 %v213_v38, %v212_v55  ;;  %v919_v55 = vld [vmem:[#allocation14_spill] sm:$0xff] }
  0x4b   :  { %v223_v30 = vadd.f32 %v222_v24, %v221_v63  ;;  %v232_v31 = vadd.f32 %v231_v52, %v230_v60  ;;  %v241_v37 = vadd.f32 %v240_v2, %v239_v41  ;;  %v250_v44 = vadd.f32 %v249_v47, %v248_v45  ;;  %v922_v60 = vld [vmem:[#allocation15_spill] sm:$0xff]  ;;  %v923_v41 = vld [vmem:[#allocation17_spill] sm:$0xff] }
  0x4c   :  { %v206_v36 = vrot.slane %v205_v1, 1  ;;  %v259_v49 = vadd.f32 %v258_v3, %v257_v20  ;;  %v816_v56 = vadd.f32 %v197_v29, %v196_v8  ;;  %v215_v42 = vrot.slane %v214_v4, 1 }
  0x4d   :  { %v224_v57 = vrot.slane %v223_v30, 1  ;;  %v233_v0 = vrot.slane %v232_v31, 1  ;;  %v242_v12 = vrot.slane %v241_v37, 1  ;;  %v251_v18 = vrot.slane %v250_v44, 1 }
  0x4e   :  { %v818_v5 = vadd.f32 %v206_v36, %v205_v1  ;;  %v260_v35 = vrot.slane %v259_v49, 1  ;;  %v820_v50 = vadd.f32 %v215_v42, %v214_v4  ;;  %v262_v43 = vadd.f32 %v712_v61, %v709_v53 }
  0x4f   :  { %v822_v58 = vadd.f32 %v224_v57, %v223_v30  ;;  %v824_v10 = vadd.f32 %v233_v0, %v232_v31  ;;  %v828_v25 = vadd.f32 %v242_v12, %v241_v37  ;;  %v830_v19 = vadd.f32 %v251_v18, %v250_v44 }
  0x50   :  { %v832_v26 = vadd.f32 %v260_v35, %v259_v49  ;;  %v271_v27 = vadd.f32 %v724_v13, %v721_v15  ;;  %v263_v39 = vadd.f32 %v262_v43, %v715_v62  ;;  %v280_v40 = vadd.f32 %v736_v33, %v733_v21  ;;  %v918_v62 = vld [vmem:[#allocation12_spill] sm:$0xff] }
  0x51   :  { %v289_v48 = vadd.f32 %v748_v14, %v745_v59  ;;  %v298_v53 = vadd.f32 %v762_v54, %v759_v28  ;;  %v307_v32 = vadd.f32 %v774_v34, %v771_v7  ;;  %v321_v51 = vsub.f32 0.0, %v756_v23  ;;  %v920_v33 = vld [vmem:[#allocation16_spill] sm:$0xff]  ;;  %v921_v14 = vld [vmem:[#allocation13_spill] sm:$0xff] }
  0x52   :  { %v272_v61 = vadd.f32 %v271_v27, %v727_v16  ;;  %v322_v15 = vsub.f32 0.0, %v784_v6  ;;  %v264_v13 = vadd.f32 %v263_v39, %v918_v62  ;;  %v281_v21 = vadd.f32 %v280_v40, %v919_v55 }
  0x53   :  { %v290_v63 = vadd.f32 %v289_v48, %v920_v33  ;;  %v299_v59 = vadd.f32 %v298_v53, %v765_v22  ;;  %v308_v16 = vadd.f32 %v307_v32, %v779_v9  ;;  %v323_v54 = vsub.f32 0.0, %v816_v56 }
  0x54   :  { %v273_v28 = vadd.f32 %v272_v61, %v921_v14  ;;  %v324_v7 = vsub.f32 0.0, %v818_v5  ;;  %v265_v34 = vrot.slane %v264_v13, 4  ;;  %v282_v11 = vadd.f32 %v281_v21, %v922_v60 }
  0x55   :  { %v291_v45 = vadd.f32 %v290_v63, %v923_v41  ;;  %v300_v20 = vadd.f32 %v299_v59, %v768_v46  ;;  %v309_v22 = vadd.f32 %v308_v16, %v782_v17  ;;  %v325_v38 = vsub.f32 0.0, %v820_v50 }
  0x56   :  { %v274_v8 = vrot.slane %v273_v28, 4  ;;  %v326_v24 = vsub.f32 0.0, %v822_v58  ;;  %v266_v9 = vadd.f32 %v265_v34, %v264_v13  ;;  %v283_v52 = vrot.slane %v282_v11, 4  ;;  %v924_v34 = vld [vmem:[#allocation11_spill] sm:$0xff] }
  0x57   :  { %v292_v1 = vrot.slane %v291_v45, 4  ;;  %v301_v2 = vrot.slane %v300_v20, 4  ;;  %v310_v3 = vrot.slane %v309_v22, 4  ;;  %v327_v29 = vsub.f32 0.0, %v824_v10 }
  0x58   :  { %v275_v47 = vadd.f32 %v274_v8, %v273_v28  ;;  %v328_v4 = vsub.f32 0.0, %v828_v25  ;;  %v267_v46 = vrot.slane %v266_v9, 2  ;;  %v284_v30 = vadd.f32 %v283_v52, %v282_v11 }
  0x59   :  { %v293_v31 = vadd.f32 %v292_v1, %v291_v45  ;;  %v302_v17 = vadd.f32 %v301_v2, %v300_v20  ;;  %v311_v37 = vadd.f32 %v310_v3, %v309_v22  ;;  %v329_v44 = vsub.f32 0.0, %v830_v19 }
  0x5a   :  { %v276_v36 = vrot.slane %v275_v47, 2  ;;  %v330_v49 = vsub.f32 0.0, %v832_v26  ;;  %v268_v42 = vadd.f32 %v267_v46, %v266_v9  ;;  %v285_v57 = vrot.slane %v284_v30, 2 }
  0x5b   :  { %v294_v0 = vrot.slane %v293_v31, 2  ;;  %v303_v12 = vrot.slane %v302_v17, 2  ;;  %v312_v35 = vrot.slane %v311_v37, 2  ;;  %v354_v43 = vsel %vm353_vm0, %v784_v6, %v756_v23 }
  0x5c   :  { %v277_v18 = vadd.f32 %v276_v36, %v275_v47  ;;  %v392_v27 = vsel %vm353_vm0, %v322_v15, %v321_v51  ;;  %v269_v39 = vrot.slane %v268_v42, 1  ;;  %v286_v40 = vadd.f32 %v285_v57, %v284_v30 }
  0x5d   :  { %v295_v48 = vadd.f32 %v294_v0, %v293_v31  ;;  %v304_v53 = vadd.f32 %v303_v12, %v302_v17  ;;  %v313_v61 = vadd.f32 %v312_v35, %v311_v37  ;;  %v356_v26 = vsel %vm355_vm1, %v816_v56, %v354_v43 }
  0x5e   :  { %v278_v19 = vrot.slane %v277_v18, 1  ;;  %v393_v32 = vsel %vm355_vm1, %v323_v54, %v392_v27  ;;  %v270_v62 = vadd.f32 %v269_v39, %v268_v42  ;;  %v287_v13 = vrot.slane %v286_v40, 1 }
  0x5f   :  { %v296_v55 = vrot.slane %v295_v48, 1  ;;  %v305_v21 = vrot.slane %v304_v53, 1  ;;  %v314_v63 = vrot.slane %v313_v61, 1  ;;  %v358_v6 = vsel %vm357_vm2, %v818_v5, %v356_v26 }
  0x60   :  { %v279_v33 = vadd.f32 %v278_v19, %v277_v18  ;;  %v394_v23 = vsel %vm357_vm2, %v324_v7, %v393_v32  ;;  %v288_v51 = vadd.f32 %v287_v13, %v286_v40  ;;  %v331_v14 = vsub.f32 0.0, %v270_v62 }
  0x61   :  { %v297_v15 = vadd.f32 %v296_v55, %v295_v48  ;;  %v306_v59 = vadd.f32 %v305_v21, %v304_v53  ;;  %v315_v28 = vadd.f32 %v314_v63, %v313_v61  ;;  %v360_v56 = vsel %vm359_vm3, %v820_v50, %v358_v6 }
  0x62   :  { %v332_v16 = vsub.f32 0.0, %v279_v33  ;;  %v395_v54 = vsel %vm359_vm3, %v325_v38, %v394_v23  ;;  %vm319_vm7 = vcmp.lt.s32.totalorder %v924_v34, 6  ;;  %v333_v60 = vsub.f32 0.0, %v288_v51 }
  0x63   :  { %v362_v11 = vsel %vm361_vm4, %v822_v58, %v360_v56  ;;  %v334_v5 = vsub.f32 0.0, %v297_v15  ;;  %v396_v41 = vsel %vm361_vm4, %v326_v24, %v395_v54  ;;  %v399_v45 = vsel %vm353_vm0, %v330_v49, %v329_v44 }
  0x64   :  { %v364_v7 = vsel %vm363_vm5, %v824_v10, %v362_v11  ;;  %v335_v20 = vsub.f32 0.0, %v306_v59  ;;  %v397_v8 = vsel %vm363_vm5, %v327_v29, %v396_v41  ;;  %v400_v22 = vsel %vm355_vm1, %v331_v14, %v399_v45 }
  0x65   :  { %v366_v50 = vsel %vm365_vm6, %v828_v25, %v364_v7  ;;  %v336_v38 = vsub.f32 0.0, %v315_v28  ;;  %v398_v9 = vsel %vm365_vm6, %v328_v4, %v397_v8  ;;  %v401_v58 = vsel %vm357_vm2, %v332_v16, %v400_v22 }
  0x66   :  { %v402_v52 = vsel %vm359_vm3, %v333_v60, %v401_v58  ;;  %v408_v10 = vsel %vm319_vm7, %v366_v50, %v398_v9 }
  0x67   :  { %v403_v24 = vsel %vm361_vm4, %v334_v5, %v402_v52  ;;  %v412_v1 = vand.u32 2147483647, %v408_v10  ;;  %v410_v35 = vmin.f32 %v408_v10, 0.0 }
  0x68   :  { %v404_v2 = vsel %vm363_vm5, %v335_v20, %v403_v24 }
  0x69   :  { %v405_v47 = vsel %vm365_vm6, %v336_v38, %v404_v2  ;;  %v414_v25 = vsub.f32 0.0, %v412_v1 }
  0x6a   :  { %v413_v3 = vand.u32 2147483647, %v405_v47  ;;  %v411_v40 = vmin.f32 %v405_v47, 0.0 }
  0x6b   :  { %v416_v29 = vmul.f32 1.442695, %v414_v25 }
  0x6c   :  { %v415_v46 = vsub.f32 0.0, %v413_v3 }
  0x6d   :  { %470 = vpow2.f32 %v416_v29 }
  0x6e   :  { %v418_v30 = vmul.f32 1.442695, %v415_v46 }
  0x70   :  { %472 = vpow2.f32 %v418_v30 }
  0x77   :  { %v471_v4 = vpop.eup %470 }
  0x78   :  { %v420_v31 = vadd.f32 1.0, %v471_v4  ;;  %v423_v36 = vmul.f32 -0.5, %v471_v4  ;;  %v426_v42 = vand.u32 2147483647, %v471_v4 }
  0x7a   :  { %v473_v17 = vpop.eup %472  ;;  %474 = vlog2.f32 %v420_v31  ;;  %v424_v49 = vadd.f32 1.0, %v423_v36  ;;  %vm427_vm8 = vcmp.lt.f32.partialorder %v426_v42, 0.0004427343 }
  0x7b   :  { %v429_v37 = vadd.f32 1.0, %v473_v17  ;;  %v432_v44 = vmul.f32 -0.5, %v473_v17  ;;  %v435_v12 = vand.u32 2147483647, %v473_v17 }
  0x7c   :  { %v425_v0 = vmul.f32 %v471_v4, %v424_v49 }
  0x7d   :  { %476 = vlog2.f32 %v429_v37  ;;  %v433_v57 = vadd.f32 1.0, %v432_v44  ;;  %vm436_vm9 = vcmp.lt.f32.partialorder %v435_v12, 0.0004427343 }
  0x7f   :  { %v434_v27 = vmul.f32 %v473_v17, %v433_v57 }
  0x84   :  { %v475_v18 = vpop.eup %474 }
  0x85   :  { %v422_v43 = vmul.f32 0.6931472, %v475_v18 }
  0x87   :  { %v477_v39 = vpop.eup %476  ;;  %v428_v48 = vsel %vm427_vm8, %v425_v0, %v422_v43 }
  0x88   :  { %v431_v53 = vmul.f32 0.6931472, %v477_v39  ;;  %v438_v19 = vsub.f32 %v410_v35, %v428_v48 }
  0x8a   :  { %v437_v61 = vsel %vm436_vm9, %v434_v27, %v431_v53 }
  0x8b   :  { %v439_v26 = vsub.f32 %v411_v40, %v437_v61 }
  0x8d   :  { %v440_v32 = vadd.f32 %v439_v26, %v438_v19 }
  0x8f   :  { %v441_v62 = vrot.slane %v440_v32, 4 }
  0x91   :  { %v442_v13 = vadd.f32 %v441_v62, %v440_v32 }
  0x93   :  { %v443_v55 = vrot.slane %v442_v13, 2 }
  0x95   :  { %v444_v21 = vadd.f32 %v443_v55, %v442_v13 }
  0x97   :  { %v445_v33 = vrot.slane %v444_v21, 1 }
  0x99   :  { %v446_v63 = vadd.f32 %v445_v33, %v444_v21 }
  0x9b   :  { %v447_v6 = vsub.f32 0.0, %v446_v63 }
  0x9d   :  { %448 = vst [vmem:[#allocation7] sm:$0x1] %v447_v6 }
  0x9e   :  { %533 = shalt.err (!%p530_p6)
}
  0x9f   :  { %s534_s11 = scalar_lea.hbm %s910_s2, 16 }
  0xa0   :  { %p535_p7 = scmp.ne.s32.totalorder %s910_s2, %s534_s11  ;;  %p538_p8 = scmp.lt.u32.totalorder %s534_s11, %s910_s2 }
  0xa2   :  { %p540_p9 = pnand %p538_p8, %p535_p7 }
  0xa4   :  { %543 = shalt.err (!%p540_p9)
}
  0xa5   :  { %458 = dma.vmem_to_hbm [thread:$0]  %s456_s6, 16, %s910_s2, [#allocation4]  }
  0xa6   :  { %548 = dma.done.wait [#allocation4], 16  }
  0xa7   :  { %549 = vsyncadd [#allocation4], 4294967280 }
  0xa8   :  { %462 = vsyncpa [#allocation3], 1 }
  0xa9   :  { %463 = vsyncpa [#allocation6], 1 }
  0xaa   :  { %464 = vsyncpa [#allocation4], 1 }

</bundles_post_ra>
